<compile_context>
chip_gen: v7x
topology: tpu7x:2x2x1
jax: 0.10.0
libtpu: 0.0.40
codegen_flags: <defaults>
</compile_context>

<pallas_src>
import functools

import jax
import jax.numpy as jnp
from jax.experimental import pallas as pl
from jax.experimental.pallas import tpu as pltpu

_VMEM_BUDGET = 24 * 1024 * 1024   # target per-grid-step working set (fits all gens)
_VMEM_LIMIT = 48 * 1024 * 1024    # scoped-VMEM limit handed to Mosaic


def _round_up(x, m):
    return (x + m - 1) // m * m


# ----------------------------------------------------------------------------
# Kernel A: cross-attention scores -> aggregated sigmoid probs
# ----------------------------------------------------------------------------
def _attn_probs_kernel(q_ref, f_ref, wq_ref, bq_ref, wk_ref, bk_ref, m_ref,
                       p_ref, *, scale, lq_valid):
    Bt, Lq, D = q_ref.shape           # Lq/Lf here are the padded block extents
    Lf = f_ref.shape[1]
    # Flatten (batch, seq): one big MXU matmul per projection (bf16 in, f32 acc).
    # Lq/Lf are multiples of 8, so these reshapes are sublane-aligned no-ops.
    q2 = q_ref[...].reshape(Bt * Lq, D)
    f2 = f_ref[...].reshape(Bt * Lf, D)
    Q = jnp.dot(q2, wq_ref[...], preferred_element_type=jnp.float32) + bq_ref[...]
    K = jnp.dot(f2, wk_ref[...], preferred_element_type=jnp.float32) + bk_ref[...]
    # mean_h (Q_h K_h^T / sqrt(dh))  ==  (Q K^T) * scale   (exact identity).
    Qb = Q.reshape(Bt, Lq, D).astype(jnp.bfloat16)
    Kb = K.reshape(Bt, Lf, D).astype(jnp.bfloat16)
    scores = jnp.einsum("bqd,bkd->bqk", Qb, Kb,
                        preferred_element_type=jnp.float32)          # [Bt,Lq,Lf]
    if lq_valid != Lq:
        # Padded query rows must not win the max over query positions.
        qrow = jax.lax.broadcasted_iota(jnp.int32, (1, Lq, 1), 1)
        scores = jnp.where(qrow < lq_valid, scores, -jnp.inf)
    agg = jnp.max(scores, axis=1)                                     # [Bt, Lf]
    # scale > 0 commutes with the max -> apply it once on the small result.
    p_ref[...] = jax.nn.sigmoid(agg * scale) * m_ref[...]             # lane-dense store


def _pick_bt(B, Lq_pad, Lf_pad, D, budget=_VMEM_BUDGET):
    # Per-batch-row VMEM: double-buffered bf16 inputs, f32 Q/K, bf16 Q/K copies,
    # f32 scores, double-buffered mask + probs.
    per_row = (2 * (Lq_pad + Lf_pad) * D * 2
               + (Lq_pad + Lf_pad) * D * 4
               + (Lq_pad + Lf_pad) * D * 2
               + Lq_pad * Lf_pad * 4
               + 4 * Lf_pad * 4)
    cap = int(budget // max(per_row, 1))
    cap = max(1, min(cap, 128))
    if cap >= 8:
        cap = (cap // 8) * 8
    bt = min(B, cap)
    # v7x has 2 TensorCores: keep >= 2 grid steps when the batch can be split.
    if B > 8 and bt >= B:
        bt = min(bt, _round_up((B + 1) // 2, 8))
    return max(bt, 1)


def attention_probs(q_embeds, f_embeds, wq, bq, wk, bk, attn_mask, num_heads):
    B, Lq, D = q_embeds.shape
    Lf = f_embeds.shape[1]
    d_head = D // num_heads
    scale = 1.0 / (num_heads * float(d_head) ** 0.5)

    # Pad Lq to a sublane multiple (free flatten) and Lf to a lane multiple
    # (unmasked full-lane output stores); padded Lf columns are killed by the
    # zero-padded mask, padded Lq rows by the in-kernel -inf masking.
    Lq_pad = _round_up(Lq, 8)
    Lf_pad = _round_up(Lf, 128)
    if Lq_pad != Lq:
        q_embeds = jnp.pad(q_embeds, ((0, 0), (0, Lq_pad - Lq), (0, 0)))
    if Lf_pad != Lf:
        f_embeds = jnp.pad(f_embeds, ((0, 0), (0, Lf_pad - Lf), (0, 0)))
        attn_mask = jnp.pad(attn_mask, ((0, 0), (0, Lf_pad - Lf)))

    # Kernel A is DMA/overhead bound: stream the embeddings in bf16.
    q_in = q_embeds.astype(jnp.bfloat16)
    f_in = f_embeds.astype(jnp.bfloat16)
    wq_bf = wq.astype(jnp.bfloat16)
    wk_bf = wk.astype(jnp.bfloat16)
    bq2 = bq.reshape(1, D).astype(jnp.float32)
    bk2 = bk.reshape(1, D).astype(jnp.float32)
    mask2 = attn_mask.astype(jnp.float32)

    Bt = _pick_bt(B, Lq_pad, Lf_pad, D)
    grid = (pl.cdiv(B, Bt),)

    out = pl.pallas_call(
        functools.partial(_attn_probs_kernel, scale=scale, lq_valid=Lq),
        out_shape=jax.ShapeDtypeStruct((B, Lf_pad), jnp.float32),
        grid=grid,
        in_specs=[
            pl.BlockSpec((Bt, Lq_pad, D), lambda i: (i, 0, 0)),     # q_embeds (bf16)
            pl.BlockSpec((Bt, Lf_pad, D), lambda i: (i, 0, 0)),     # f_embeds (bf16)
            pl.BlockSpec((D, D), lambda i: (0, 0)),                 # Wq (bf16, resident)
            pl.BlockSpec((1, D), lambda i: (0, 0)),                 # bq
            pl.BlockSpec((D, D), lambda i: (0, 0)),                 # Wk (bf16, resident)
            pl.BlockSpec((1, D), lambda i: (0, 0)),                 # bk
            pl.BlockSpec((Bt, Lf_pad), lambda i: (i, 0)),           # attention_mask
        ],
        out_specs=pl.BlockSpec((Bt, Lf_pad), lambda i: (i, 0)),
        compiler_params=pltpu.CompilerParams(
            dimension_semantics=("parallel",),
            vmem_limit_bytes=_VMEM_LIMIT),
    )(q_in, f_in, wq_bf, bq2, wk_bf, bk2, mask2)
    return out[:, :Lf]


# ----------------------------------------------------------------------------
# Kernel B: per-sample value = max_seq( log1p(relu(cat_logits)) * cat_mask )
#           Actions are binary, so the transcendental work is action-independent.
# ----------------------------------------------------------------------------
def _value_kernel(ql_ref, fl_ref, a_ref, qm_ref, fm_ref, v_ref, *, samples):
    ql = ql_ref[0].astype(jnp.float32)               # [Lq, Vt]  bf16 DMA -> f32 math
    fl = fl_ref[0].astype(jnp.float32)               # [Lf, Vt]
    qm = qm_ref[0]                                   # [Lq, 1]
    fm = fm_ref[0]                                   # [Lf, 1]
    act = a_ref[...]                                 # [1, S, Lf, 1]
    # Action-independent pieces: computed ONCE per (b, v-tile), shared by all S.
    qmax = jnp.max(jnp.log1p(jnp.maximum(ql, 0.0)) * qm,
                   axis=0, keepdims=True)            # [1, Vt]
    base = jnp.log1p(jnp.maximum(fl, 0.0)) * fm      # [Lf, Vt]  (>= 0 everywhere)
    # action in {0,1}: log1p(relu(action*x))*mask == where(action>0, base, 0).
    rows = []
    for s in range(samples):                         # S is small & static
        act_s = act[0, s]                            # [Lf, 1]
        fmax = jnp.max(jnp.where(act_s > 0.0, base, 0.0),
                       axis=0, keepdims=True)        # [1, Vt]
        rows.append(jnp.maximum(qmax, fmax))
    v_ref[0] = jnp.concatenate(rows, axis=0)         # [S, Vt] lane-dense store


def _pick_vt(V_pad, S, Lq, Lf, budget=_VMEM_BUDGET):
    for vt in (V_pad, 8192, 4096, 2048, 1024, 512, 256, 128):
        if vt > V_pad or vt % 128:
            continue
        use = (2 * (Lq + Lf) * vt * 2                 # double-buffered bf16 logit blocks
               + 2 * S * vt * 4                       # double-buffered f32 output block
               + (Lq + 2 * Lf + S + 4) * vt * 4)      # in-kernel f32 temporaries
        if use <= budget:
            return vt
    return 128


def sample_values(q_logits, f_logits, actions, q_mask, attn_mask):
    """Returns values laid out (B, S, V) -> no host-side S/B transpose needed."""
    S, B, Lf = actions.shape
    _, Lq, V = q_logits.shape

    # Pad V to lane-dense multiples of 128; padded lanes evaluate to 0 and are
    # sliced off afterwards (log1p(relu(0)) == 0, no cross-lane reduction).
    V_pad = _round_up(V, 128)
    if V_pad != V:
        q_logits = jnp.pad(q_logits, ((0, 0), (0, 0), (0, V_pad - V)))
        f_logits = jnp.pad(f_logits, ((0, 0), (0, 0), (0, V_pad - V)))

    Vt = _pick_vt(V_pad, S, Lq, Lf)

    act4 = jnp.transpose(actions, (1, 0, 2)).astype(jnp.float32).reshape(B, S, Lf, 1)
    qm3 = q_mask.astype(jnp.float32).reshape(B, Lq, 1)
    fm3 = attn_mask.astype(jnp.float32).reshape(B, Lf, 1)

    grid = (B, pl.cdiv(V_pad, Vt))   # b leading (parallel); logits DMA'd per tile
    out = pl.pallas_call(
        functools.partial(_value_kernel, samples=S),
        out_shape=jax.ShapeDtypeStruct((B, S, V_pad), jnp.float32),
        grid=grid,
        in_specs=[
            pl.BlockSpec((1, Lq, Vt), lambda b, v: (b, 0, v)),       # q_logits (bf16)
            pl.BlockSpec((1, Lf, Vt), lambda b, v: (b, 0, v)),       # f_logits (bf16)
            pl.BlockSpec((1, S, Lf, 1), lambda b, v: (b, 0, 0, 0)),  # actions
            pl.BlockSpec((1, Lq, 1), lambda b, v: (b, 0, 0)),        # q_mask
            pl.BlockSpec((1, Lf, 1), lambda b, v: (b, 0, 0)),        # attn_mask
        ],
        out_specs=pl.BlockSpec((1, S, Vt), lambda b, v: (b, 0, v)),
        compiler_params=pltpu.CompilerParams(
            dimension_semantics=("parallel", "parallel"),
            vmem_limit_bytes=_VMEM_LIMIT),
    )(q_logits.astype(jnp.bfloat16), f_logits.astype(jnp.bfloat16),
      act4, qm3, fm3)
    return out[:, :, :V]              # [B, S, V]


# ----------------------------------------------------------------------------
# Forward pass (mirrors AttentionHead.forward)
# ----------------------------------------------------------------------------
def attention_head_forward(params, q_embeds, q_logits, q_mask,
                           f_embeds, f_logits, attention_mask,
                           *, num_heads, samples, rng_key):
    # probs = sigmoid(max_q(mean_heads(QK^T/sqrt(dh)))) * attention_mask
    probs = attention_probs(q_embeds, f_embeds,
                            params["wq"], params["bq"],
                            params["wk"], params["bk"],
                            attention_mask, num_heads)            # [B, Lf]

    actions_list, logprobs_list = [], []
    key = rng_key
    for i in range(samples):
        if i == samples - 1:
            action = (probs >= 0.5).astype(q_logits.dtype)
        else:
            key, sub = jax.random.split(key)
            action = jax.random.bernoulli(sub, probs).astype(q_logits.dtype)
        actions_list.append(action)
        p_hi = jnp.clip(probs, 1e-38, 1.0)
        p_lo = jnp.clip(probs, 0.0, 1.0 - 1e-7)
        logp = jnp.where(action > 0.5, jnp.log(p_hi), jnp.log1p(-p_lo)).sum(-1)
        logprobs_list.append(logp)

    actions = jnp.stack(actions_list)                             # [S, B, Lf]
    values_bsv = sample_values(q_logits, f_logits, actions,
                               q_mask, attention_mask)            # [B, S, V]

    values_list = [values_bsv[:, i] for i in range(samples)]
    return values_list, logprobs_list, actions_list, probs


# ----------------------------------------------------------------------------
# Pure-JAX reference (f32) for a loose correctness check against bf16 kernels.
# ----------------------------------------------------------------------------
def _ref_forward(params, q_embeds, q_logits, q_mask, f_embeds, f_logits,
                 attention_mask, actions_list, num_heads):
    D = q_embeds.shape[-1]
    dh = D // num_heads
    Q = q_embeds @ params["wq"] + params["bq"]
    K = f_embeds @ params["wk"] + params["bk"]
    scores = jnp.einsum("bqd,bkd->bqk", Q, K) / (num_heads * float(dh) ** 0.5)
    probs = jax.nn.sigmoid(jnp.max(scores, axis=1)) * attention_mask
    vals = []
    m = jnp.concatenate([q_mask, attention_mask], axis=1)[:, :, None]
    for a in actions_list:
        agg = jnp.concatenate([q_logits, f_logits * a[:, :, None]], axis=1)
        vals.append(jnp.max(jnp.log1p(jnp.maximum(agg, 0.0)) * m, axis=1))
    return probs, vals


# ----------------------------------------------------------------------------
# Demo
# ----------------------------------------------------------------------------
if __name__ == "__main__":
    B, Lq, Lf, D, V = 2, 8, 16, 32, 32
    NUM_HEADS = 4
    SAMPLES = 3

    key = jax.random.PRNGKey(0)
    keys = jax.random.split(key, 10)

    # Deterministic synthetic parameters (CrossAttentionLayer query/key Linear).
    params = {
        "wq": 0.05 * jax.random.normal(keys[0], (D, D), jnp.float32),
        "bq": 0.01 * jax.random.normal(keys[1], (D,), jnp.float32),
        "wk": 0.05 * jax.random.normal(keys[2], (D, D), jnp.float32),
        "bk": 0.01 * jax.random.normal(keys[3], (D,), jnp.float32),
    }

    # Stand-ins for encoder outputs (q_out.* and self.q_encoder(...)).
    q_embeds = jax.random.normal(keys[4], (B, Lq, D), jnp.float32)
    f_embeds = jax.random.normal(keys[5], (B, Lf, D), jnp.float32)
    q_logits = jax.random.normal(keys[6], (B, Lq, V), jnp.float32)
    f_logits = jax.random.normal(keys[7], (B, Lf, V), jnp.float32)
    q_mask = jnp.ones((B, Lq), jnp.float32)
    attention_mask = jnp.concatenate(
        [jnp.ones((B, Lf - 4), jnp.float32), jnp.zeros((B, 4), jnp.float32)],
        axis=1)

    values, logprobs, actions, probs = attention_head_forward(
        params, q_embeds, q_logits, q_mask, f_embeds, f_logits, attention_mask,
        num_heads=NUM_HEADS, samples=SAMPLES, rng_key=keys[8])

    jax.block_until_ready(values)
    jax.block_until_ready(logprobs)
    jax.block_until_ready(actions)
    jax.block_until_ready(probs)

    assert len(values) == SAMPLES and values[0].shape == (B, V)
    assert len(logprobs) == SAMPLES and logprobs[0].shape == (B,)
    assert len(actions) == SAMPLES and actions[0].shape == (B, Lf)
    assert probs.shape == (B, Lf)

    # Loose tolerance check vs f32 reference (kernels use bf16 DMA / MXU inputs).
    ref_probs, ref_vals = _ref_forward(params, q_embeds, q_logits, q_mask,
                                       f_embeds, f_logits, attention_mask,
                                       actions, NUM_HEADS)
    assert bool(jnp.allclose(probs, ref_probs, atol=5e-2, rtol=5e-2))
    for i in range(SAMPLES):
        assert bool(jnp.allclose(values[i], ref_vals[i], atol=5e-2, rtol=5e-2))

    print("KERNEL_OK")
</pallas_src>

<mosaic_0001>
module attributes {stable_mosaic.version = 11 : i64} {
  func.func @_attn_probs_kernel(%arg0: i32, %arg1: memref<2x8x32xbf16, #tpu.memory_space<vmem>>, %arg2: memref<2x128x32xbf16, #tpu.memory_space<vmem>>, %arg3: memref<32x32xbf16, #tpu.memory_space<vmem>>, %arg4: memref<1x32xf32, #tpu.memory_space<vmem>>, %arg5: memref<32x32xbf16, #tpu.memory_space<vmem>>, %arg6: memref<1x32xf32, #tpu.memory_space<vmem>>, %arg7: memref<2x128xf32, #tpu.memory_space<vmem>>, %arg8: memref<2x128xf32, #tpu.memory_space<vmem>>) attributes {dimension_semantics = [#tpu.dimension_semantics<parallel>], iteration_bounds = array<i64: 1>, scalar_prefetch = 0 : i64, scratch_operands = 0 : i64, tpu.core_type = #tpu.core_type<tc>, window_params = [{transform_indices = @transform_0, window_bounds = array<i64: 2, 8, 32>}, {transform_indices = @transform_1, window_bounds = array<i64: 2, 128, 32>}, {pipeline_mode = #tpu.pipeline_mode<synchronous>, transform_indices = @transform_2, window_bounds = array<i64: 32, 32>}, {pipeline_mode = #tpu.pipeline_mode<synchronous>, transform_indices = @transform_3, window_bounds = array<i64: 1, 32>}, {pipeline_mode = #tpu.pipeline_mode<synchronous>, transform_indices = @transform_4, window_bounds = array<i64: 32, 32>}, {pipeline_mode = #tpu.pipeline_mode<synchronous>, transform_indices = @transform_5, window_bounds = array<i64: 1, 32>}, {transform_indices = @transform_6, window_bounds = array<i64: 2, 128>}, {transform_indices = @transform_7, window_bounds = array<i64: 2, 128>}]} {
    %c0 = arith.constant 0 : index
    %c0_0 = arith.constant 0 : index
    %c0_1 = arith.constant 0 : index
    %0 = vector.load %arg1[%c0, %c0_0, %c0_1] : memref<2x8x32xbf16, #tpu.memory_space<vmem>>, vector<2x8x32xbf16>
    %1 = vector.shape_cast %0 : vector<2x8x32xbf16> to vector<16x32xbf16>
    %c0_2 = arith.constant 0 : index
    %c0_3 = arith.constant 0 : index
    %c0_4 = arith.constant 0 : index
    %2 = vector.load %arg2[%c0_2, %c0_3, %c0_4] : memref<2x128x32xbf16, #tpu.memory_space<vmem>>, vector<2x128x32xbf16>
    %3 = vector.shape_cast %2 : vector<2x128x32xbf16> to vector<256x32xbf16>
    %c0_5 = arith.constant 0 : index
    %c0_6 = arith.constant 0 : index
    %4 = vector.load %arg3[%c0_5, %c0_6] : memref<32x32xbf16, #tpu.memory_space<vmem>>, vector<32x32xbf16>
    %cst = arith.constant dense<0.000000e+00> : vector<16x32xf32>
    %5 = tpu.matmul %1, %4, %cst {dimension_numbers = #tpu.dot_dimension_numbers<[1], [0], [0], [1], [0, 0, 1, 1], [], []>} : vector<16x32xbf16>, vector<32x32xbf16>, vector<16x32xf32> -> vector<16x32xf32>
    %c0_7 = arith.constant 0 : index
    %c0_8 = arith.constant 0 : index
    %6 = vector.load %arg4[%c0_7, %c0_8] : memref<1x32xf32, #tpu.memory_space<vmem>>, vector<1x32xf32>
    %7 = vector.broadcast %6 : vector<1x32xf32> to vector<16x32xf32>
    %8 = arith.addf %5, %7 : vector<16x32xf32>
    %c0_9 = arith.constant 0 : index
    %c0_10 = arith.constant 0 : index
    %9 = vector.load %arg5[%c0_9, %c0_10] : memref<32x32xbf16, #tpu.memory_space<vmem>>, vector<32x32xbf16>
    %cst_11 = arith.constant dense<0.000000e+00> : vector<256x32xf32>
    %10 = tpu.matmul %3, %9, %cst_11 {dimension_numbers = #tpu.dot_dimension_numbers<[1], [0], [0], [1], [0, 0, 1, 1], [], []>} : vector<256x32xbf16>, vector<32x32xbf16>, vector<256x32xf32> -> vector<256x32xf32>
    %c0_12 = arith.constant 0 : index
    %c0_13 = arith.constant 0 : index
    %11 = vector.load %arg6[%c0_12, %c0_13] : memref<1x32xf32, #tpu.memory_space<vmem>>, vector<1x32xf32>
    %12 = vector.broadcast %11 : vector<1x32xf32> to vector<256x32xf32>
    %13 = arith.addf %10, %12 : vector<256x32xf32>
    %14 = vector.shape_cast %8 : vector<16x32xf32> to vector<2x8x32xf32>
    %15 = arith.truncf %14 : vector<2x8x32xf32> to vector<2x8x32xbf16>
    %16 = vector.shape_cast %13 : vector<256x32xf32> to vector<2x128x32xf32>
    %17 = arith.truncf %16 : vector<2x128x32xf32> to vector<2x128x32xbf16>
    "tpu.trace_start"() <{level = 10 : i32, message = "bqd,bkd->bqk"}> : () -> ()
    %cst_14 = arith.constant dense<0.000000e+00> : vector<2x8x128xf32>
    %18 = tpu.matmul %15, %17, %cst_14 {dimension_numbers = #tpu.dot_dimension_numbers<[2], [2], [1], [1], [0, 0, 0, 1, 1, 1], [0], [0]>} : vector<2x8x32xbf16>, vector<2x128x32xbf16>, vector<2x8x128xf32> -> vector<2x8x128xf32>
    "tpu.trace_stop"() : () -> ()
    %cst_15 = arith.constant dense<0xFF800000> : vector<2x128xf32>
    %19 = vector.multi_reduction <maximumf>, %18, %cst_15 [1] : vector<2x8x128xf32> to vector<2x128xf32>
    %cst_16 = arith.constant 0.0883883461 : f32
    %20 = vector.broadcast %cst_16 : f32 to vector<2x128xf32>
    %21 = arith.mulf %19, %20 : vector<2x128xf32>
    %22 = arith.negf %21 : vector<2x128xf32>
    %23 = math.exp %22 : vector<2x128xf32>
    %cst_17 = arith.constant 1.000000e+00 : f32
    %24 = vector.broadcast %cst_17 : f32 to vector<2x128xf32>
    %25 = arith.addf %24, %23 : vector<2x128xf32>
    %26 = arith.divf %24, %25 : vector<2x128xf32>
    %c0_18 = arith.constant 0 : index
    %c0_19 = arith.constant 0 : index
    %27 = vector.load %arg7[%c0_18, %c0_19] : memref<2x128xf32, #tpu.memory_space<vmem>>, vector<2x128xf32>
    %28 = arith.mulf %26, %27 : vector<2x128xf32>
    %c0_20 = arith.constant 0 : index
    %c0_21 = arith.constant 0 : index
    %29 = vector.load %arg8[%c0_20, %c0_21] : memref<2x128xf32, #tpu.memory_space<vmem>>, vector<2x128xf32>
    tpu.vector_store %arg8[%c0_20, %c0_21], %28 {strides = array<i32>} : memref<2x128xf32, #tpu.memory_space<vmem>>, vector<2x128xf32>,
    return
  }
  func.func @transform_0(%arg0: i32) -> (i32, i32, i32) {
    %c0_i32 = arith.constant 0 : i32
    %c0_i32_0 = arith.constant 0 : i32
    %c0_i32_1 = arith.constant 0 : i32
    return %arg0, %c0_i32, %c0_i32_0 : i32, i32, i32
  }
  func.func @transform_1(%arg0: i32) -> (i32, i32, i32) {
    %c0_i32 = arith.constant 0 : i32
    %c0_i32_0 = arith.constant 0 : i32
    %c0_i32_1 = arith.constant 0 : i32
    return %arg0, %c0_i32, %c0_i32_0 : i32, i32, i32
  }
  func.func @transform_2(%arg0: i32) -> (i32, i32) {
    %c0_i32 = arith.constant 0 : i32
    %c0_i32_0 = arith.constant 0 : i32
    %c0_i32_1 = arith.constant 0 : i32
    return %c0_i32, %c0_i32_0 : i32, i32
  }
  func.func @transform_3(%arg0: i32) -> (i32, i32) {
    %c0_i32 = arith.constant 0 : i32
    %c0_i32_0 = arith.constant 0 : i32
    %c0_i32_1 = arith.constant 0 : i32
    return %c0_i32, %c0_i32_0 : i32, i32
  }
  func.func @transform_4(%arg0: i32) -> (i32, i32) {
    %c0_i32 = arith.constant 0 : i32
    %c0_i32_0 = arith.constant 0 : i32
    %c0_i32_1 = arith.constant 0 : i32
    return %c0_i32, %c0_i32_0 : i32, i32
  }
  func.func @transform_5(%arg0: i32) -> (i32, i32) {
    %c0_i32 = arith.constant 0 : i32
    %c0_i32_0 = arith.constant 0 : i32
    %c0_i32_1 = arith.constant 0 : i32
    return %c0_i32, %c0_i32_0 : i32, i32
  }
  func.func @transform_6(%arg0: i32) -> (i32, i32) {
    %c0_i32 = arith.constant 0 : i32
    %c0_i32_0 = arith.constant 0 : i32
    return %arg0, %c0_i32 : i32, i32
  }
  func.func @transform_7(%arg0: i32) -> (i32, i32) {
    %c0_i32 = arith.constant 0 : i32
    %c0_i32_0 = arith.constant 0 : i32
    return %arg0, %c0_i32 : i32, i32
  }
}

</mosaic_0001>

<bundles_post_ra>
// kernel: tpu_custom_call.1
= control target key start
LH: loop header
LB: loop body
LE: loop exit
PB: predicated region body
PF: predicated region fallthrough
CT: control target
= control target key end

     0   :  { %vm90_vm0 = vcmask 261120   ;;  %v876_v3 = vmov 0.0   ;;  %vm877_vm1 = vmmov 0   ;;  %s1111_s0 = inlined_call_operand.vmem [shape: bf16[2,8,32], index: 0, kind: input, shape index: {}]   ;;  %s1112_s1 = inlined_call_operand.vmem [shape: bf16[2,128,32], index: 1, kind: input, shape index: {}]   ;;  %s1113_s2 = inlined_call_operand.vmem [shape: bf16[32,32], index: 2, kind: input, shape index: {}]   ;;  %s1114_s3 = inlined_call_operand.vmem [shape: f32[1,32], index: 3, kind: input, shape index: {}]   ;;  %s1115_s4 = inlined_call_operand.vmem [shape: bf16[32,32], index: 4, kind: input, shape index: {}]   ;;  %s1116_s5 = inlined_call_operand.vmem [shape: f32[1,32], index: 5, kind: input, shape index: {}]   ;;  %s1117_s6 = inlined_call_operand.vmem [shape: f32[2,128], index: 6, kind: input, shape index: {}]   ;;  %s1118_s7 = inlined_call_operand.hbm [shape: f32[2,128], index: 7, kind: output, shape index: {}]  }
   0x1   :  { %v823_v0 = vld [vmem:[%s1115_s4] sm:$0xff]   ;;  %v824_v1 = vld [vmem:[%s1115_s4 + $0x8] sm:$0xff]   ;;  %736 = vmatprep.subr.bf16.mxu0 %v876_v3  ;;  %740 = vmatprep.mubr.msk.bf16.mxu0 %vm877_vm1, %v876_v3  ;;  %v827_v5 = vld [vmem:[%s1112_s1 + $0x10] sm:$0xff]  }
   0x2   :  { %744 = vmatprep.subr.bf16.mxu1 %v823_v0  ;;  %v825_v2 = vld [vmem:[%s1112_s1] sm:$0xff]   ;;  %v826_v4 = vld [vmem:[%s1112_s1 + $0x8] sm:$0xff]   ;;  %v828_v6 = vld [vmem:[%s1112_s1 + $0x18] sm:$0xff]  }
   0x3   :  { %745 = vmatpush3.bf16.msra.mxu1 %v823_v0  ;;  %748 = vmatprep.mubr.msk.bf16.mxu1 %vm90_vm0, %v825_v2  ;;  %v829_v7 = vld [vmem:[%s1112_s1 + $0x20] sm:$0xff]   ;;  %v842_v9 = vld [vmem:[%s1113_s2 + $0x8] sm:$0xff]  }
   0x4   :  { %746 = vmatprep.subr.bf16.mxu1 %v824_v1  ;;  %v841_v8 = vld [vmem:[%s1113_s2] sm:$0xff]  }
   0x5   :  { %737 = vmatpush3.bf16.msra.mxu0 %v841_v8 }
   0x6   :  { %738 = vmatprep.subr.bf16.mxu0 %v876_v3 }
   0x7   :  { %747 = vmatpush3.bf16.msra.mxu1 %v824_v1 }
   0x8   :  { %800 = vmatprep.subr.bf16.mxu1 %v876_v3 }
   0xa   :  { %749 = vmatmul.mubr.msk.bf16.vlgmr.msra.gmra.mrb[0].mxu1 %vm90_vm0, %v826_v4 }
   0xb   :  { %752 = vmatprep.mubr.msk.bf16.mxu1 %vm90_vm0, %v827_v5 }
  0x12   :  { %753 = vmatmul.mubr.msk.bf16.gmra.mrb[4].mxu1 %vm90_vm0, %v828_v6 }
  0x13   :  { %756 = vmatprep.mubr.msk.bf16.mxu1 %vm90_vm0, %v829_v7 }
  0x14   :  { %12 = vsyncpa [#allocation3], 0  ;;  %v830_v10 = vld [vmem:[%s1112_s1 + $0x28] sm:$0xff]   ;;  %v831_v11 = vld [vmem:[%s1112_s1 + $0x30] sm:$0xff]   ;;  %739 = vmatpush3.bf16.msra.mxu0 %v842_v9  ;;  %s878_s19 = smov [#allocation2]   ;;  %vm635_vm2 = vcmask 1041409  }
  0x15   :  { %v843_v12 = vld [vmem:[%s1111_s0] sm:$0xff]   ;;  %780 = vmatprep.subr.bf16.mxu0 %v876_v3  ;;  %v832_v13 = vld [vmem:[%s1112_s1 + $0x38] sm:$0xff]   ;;  %v834_v15 = vld [vmem:[%s1112_s1 + $0x48] sm:$0xff]   ;;  %s645_s20 = sshll.u32 %s878_s19, 4  ;;  %s646_s20 = int_to_ptr.vmem [resolvable:$true] %s645_s20 }
  0x16   :  { %v833_v14 = vld [vmem:[%s1112_s1 + $0x40] sm:$0xff]   ;;  %v835_v16 = vld [vmem:[%s1112_s1 + $0x50] sm:$0xff]   ;;  %v836_v17 = vld [vmem:[%s1112_s1 + $0x58] sm:$0xff]   ;;  %s852_s21 = scalar_lea.vmem %s646_s20, 32  ;;  %p857_p1 = scmp.lt.s32.totalorder %s646_s20, %s646_s20 }
  0x17   :  { %741 = vmatmul.mubr.msk.bf16.vlgmr.msra.gmra.mrb[0].mxu0 %vm90_vm0, %v843_v12  ;;  %v837_v18 = vld [vmem:[%s1112_s1 + $0x60] sm:$0xff]   ;;  %v838_v19 = vld [vmem:[%s1112_s1 + $0x68] sm:$0xff]   ;;  %v839_v20 = vld [vmem:[%s1112_s1 + $0x70] sm:$0xff]   ;;  %p853_p0 = scmp.ne.s32.totalorder %s646_s20, %s852_s21  ;;  %p858_p2 = scmp.lt.s32.totalorder %s852_s21, %s852_s21 }
  0x18   :  { %796 = vmatprep.mubr.msk.bf16.mxu0 %vm877_vm1, %v876_v3  ;;  %v840_v21 = vld [vmem:[%s1112_s1 + $0x78] sm:$0xff]   ;;  %v1012_v23 = vld [vmem:[%s1116_s5] ss:$0 sm:$0xff] }
  0x19   :  { %p859_p3 = por %p858_p2, %p857_p1 }
  0x1a   :  { %757 = vmatmul.mubr.msk.bf16.gmra.mrb[8].mxu1 %vm90_vm0, %v830_v10 }
  0x1b   :  { %760 = vmatprep.mubr.msk.bf16.mxu1 %vm90_vm0, %v831_v11  ;;  %p860_p4 = pnand %p859_p3, %p853_p0 }
  0x22   :  { %761 = vmatmul.mubr.msk.bf16.gmra.mrb[12].mxu1 %vm90_vm0, %v832_v13 }
  0x23   :  { %764 = vmatprep.mubr.msk.bf16.mxu1 %vm90_vm0, %v833_v14 }
  0x2a   :  { %765 = vmatmul.mubr.msk.bf16.gmra.mrb[16].mxu1 %vm90_vm0, %v834_v15 }
  0x2b   :  { %768 = vmatprep.mubr.msk.bf16.mxu1 %vm90_vm0, %v835_v16 }
  0x32   :  { %769 = vmatmul.mubr.msk.bf16.gmra.mrb[20].mxu1 %vm90_vm0, %v836_v17 }
  0x33   :  { %772 = vmatprep.mubr.msk.bf16.mxu1 %vm90_vm0, %v837_v18 }
  0x3a   :  { %773 = vmatmul.mubr.msk.bf16.gmra.mrb[24].mxu1 %vm90_vm0, %v838_v19 }
  0x3b   :  { %776 = vmatprep.mubr.msk.bf16.mxu1 %vm90_vm0, %v839_v20 }
  0x42   :  { %777 = vmatmul.mubr.msk.bf16.gmra.mrb[28].mxu1 %vm90_vm0, %v840_v21 }
  0x43   :  { %816 = vmatprep.mubr.msk.bf16.mxu1 %vm877_vm1, %v876_v3 }
  0xdd   :  { %v750_v22 = vpop.f32.mrb[0].mxu1 }
  0xde   :  { %v320_v24 = vpop.f32.mrb[1].mxu1  ;;  %v329_v26 = vadd.f32 %v750_v22, %v1012_v23 }
  0xdf   :  { %v751_v25 = vpop.f32.mrb[2].mxu1  ;;  %v321_v29 = vadd.f32 %v1012_v23, %v320_v24 }
  0xe0   :  { %v332_v27 = vadd.f32 %v751_v25, %v1012_v23  ;;  %v323_v28 = vpop.f32.mrb[3].mxu1 }
  0xe1   :  { %v324_v30 = vadd.f32 %v1012_v23, %v323_v28 }
  0xe2   :  { %v450_v31 = vpack.c.bf16 %v332_v27, %v329_v26 }
  0xe3   :  { %v449_v32 = vpack.c.bf16 %v324_v30, %v321_v29 }
  0xe4   :  { %v472_v45 = vsel %vm90_vm0, %v450_v31, 0 }
  0xe5   :  { %v754_v33 = vpop.f32.mrb[4].mxu1  ;;  %v469_v34 = vsel %vm90_vm0, %v449_v32, 0 }
  0xe6   :  { %v336_v35 = vpop.f32.mrb[5].mxu1  ;;  %781 = vmatpush3.bf16.xpose.msra.mxu0 %v469_v34  ;;  %v345_v37 = vadd.f32 %v754_v33, %v1012_v23 }
  0xe7   :  { %v755_v36 = vpop.f32.mrb[6].mxu1  ;;  %782 = vmatprep.subr.bf16.mxu0 %v876_v3  ;;  %v337_v40 = vadd.f32 %v1012_v23, %v336_v35 }
  0xe8   :  { %v348_v38 = vadd.f32 %v755_v36, %v1012_v23  ;;  %v339_v39 = vpop.f32.mrb[7].mxu1 }
  0xe9   :  { %v340_v41 = vadd.f32 %v1012_v23, %v339_v39 }
  0xea   :  { %v452_v42 = vpack.c.bf16 %v348_v38, %v345_v37  ;;  %v1025_v47 = vpop.f32.mrb[0].mxu0 }
  0xeb   :  { %v451_v43 = vpack.c.bf16 %v340_v41, %v337_v40  ;;  %v742_v49 = vpop.f32.mrb[1].mxu0 }
  0xec   :  { %v1030_v53 = vpop.f32.mrb[2].mxu0  ;;  %v478_v8 = vsel %vm90_vm0, %v452_v42, 0 }
  0xed   :  { %v758_v44 = vpop.f32.mrb[8].mxu1  ;;  %v743_v56 = vpop.f32.mrb[3].mxu0  ;;  %v475_v60 = vsel %vm90_vm0, %v451_v43, 0 }
  0xee   :  { %v352_v46 = vpop.f32.mrb[9].mxu1  ;;  %783 = vmatpush3.bf16.xpose.msra.mxu0 %v472_v45  ;;  %v361_v50 = vadd.f32 %v758_v44, %v1012_v23  ;;  %v653_v56 = vld [vmem:[%s1114_s3] ss:$0 sm:$0xff] }
  0xef   :  { %v759_v48 = vpop.f32.mrb[10].mxu1  ;;  %784 = vmatprep.subr.bf16.mxu0 %v876_v3  ;;  %v353_v54 = vadd.f32 %v1012_v23, %v352_v46 }
  0xf0   :  { %v364_v51 = vadd.f32 %v759_v48, %v1012_v23  ;;  %v355_v52 = vpop.f32.mrb[11].mxu1 }
  0xf1   :  { %v356_v55 = vadd.f32 %v1012_v23, %v355_v52 }
  0xf2   :  { %v454_v57 = vpack.c.bf16 %v364_v51, %v361_v50 }
  0xf3   :  { %v453_v58 = vpack.c.bf16 %v356_v55, %v353_v54 }
  0xf4   :  { %v484_v31 = vsel %vm90_vm0, %v454_v57, 0 }
  0xf5   :  { %v762_v59 = vpop.f32.mrb[12].mxu1  ;;  %v481_v18 = vsel %vm90_vm0, %v453_v58, 0 }
  0xf6   :  { %v368_v61 = vpop.f32.mrb[13].mxu1  ;;  %785 = vmatpush3.bf16.xpose.msra.mxu0 %v475_v60  ;;  %v1037_v63 = vadd.f32 %v762_v59, %v1012_v23  ;;  %v129_v60 = vadd.f32 %v653_v56, %v1025_v47 }
  0xf7   :  { %v763_v62 = vpop.f32.mrb[14].mxu1  ;;  %786 = vmatprep.subr.bf16.mxu0 %v876_v3  ;;  %v369_v2 = vadd.f32 %v1012_v23, %v368_v61 }
  0xf8   :  { %v1040_v0 = vadd.f32 %v763_v62, %v1012_v23  ;;  %v371_v1 = vpop.f32.mrb[15].mxu1 }
  0xf9   :  { %v372_v4 = vadd.f32 %v1012_v23, %v371_v1 }
  0xfa   :  { %v456_v5 = vpack.c.bf16 %v1040_v0, %v1037_v63  ;;  %v132_v0 = vadd.f32 %v653_v56, %v1030_v53 }
  0xfb   :  { %v455_v6 = vpack.c.bf16 %v372_v4, %v369_v2 }
  0xfc   :  { %v490_v58 = vsel %vm90_vm0, %v456_v5, 0  ;;  %v448_v1 = vpack.c.bf16 %v132_v0, %v132_v0 }
  0xfd   :  { %v766_v7 = vpop.f32.mrb[16].mxu1  ;;  %v487_v43 = vsel %vm90_vm0, %v455_v6, 0 }
  0xfe   :  { %v384_v9 = vpop.f32.mrb[17].mxu1  ;;  %787 = vmatpush3.bf16.xpose.msra.mxu0 %v478_v8  ;;  %v393_v11 = vadd.f32 %v766_v7, %v1012_v23 }
  0xff   :  { %v767_v10 = vpop.f32.mrb[18].mxu1  ;;  %788 = vmatprep.subr.bf16.mxu0 %v876_v3  ;;  %v385_v14 = vadd.f32 %v1012_v23, %v384_v9 }
 0x100   :  { %v396_v12 = vadd.f32 %v767_v10, %v1012_v23  ;;  %v387_v13 = vpop.f32.mrb[19].mxu1 }
 0x101   :  { %v388_v15 = vadd.f32 %v1012_v23, %v387_v13 }
 0x102   :  { %v458_v16 = vpack.c.bf16 %v396_v12, %v393_v11 }
 0x103   :  { %v457_v17 = vpack.c.bf16 %v388_v15, %v385_v14 }
 0x104   :  { %v539_v32 = vsel %vm90_vm0, %v458_v16, 0 }
 0x105   :  { %v536_v19 = vsel %vm90_vm0, %v457_v17, 0  ;;  %v770_v20 = vpop.f32.mrb[20].mxu1 }
 0x106   :  { %789 = vmatpush3.bf16.xpose.msra.mxu0 %v481_v18  ;;  %801 = vmatpush3.bf16.xpose.msra.mxu1 %v536_v19  ;;  %v409_v21 = vadd.f32 %v770_v20, %v1012_v23  ;;  %v400_v22 = vpop.f32.mrb[21].mxu1 }
 0x107   :  { %v401_v24 = vadd.f32 %v1012_v23, %v400_v22  ;;  %v771_v25 = vpop.f32.mrb[22].mxu1  ;;  %790 = vmatprep.subr.bf16.mxu0 %v876_v3  ;;  %802 = vmatprep.subr.bf16.mxu1 %v876_v3 }
 0x108   :  { %v412_v26 = vadd.f32 %v771_v25, %v1012_v23  ;;  %v403_v27 = vpop.f32.mrb[23].mxu1 }
 0x109   :  { %v404_v28 = vadd.f32 %v1012_v23, %v403_v27 }
 0x10a   :  { %v460_v29 = vpack.c.bf16 %v412_v26, %v409_v21 }
 0x10b   :  { %v459_v30 = vpack.c.bf16 %v404_v28, %v401_v24 }
 0x10c   :  { %v545_v59 = vsel %vm90_vm0, %v460_v29, 0 }
 0x10d   :  { %v774_v33 = vpop.f32.mrb[24].mxu1  ;;  %v542_v44 = vsel %vm90_vm0, %v459_v30, 0  ;;  %v625_v30 = vld [vmem:[%s1117_s6] sm:$0x3] }
 0x10e   :  { %791 = vmatpush3.bf16.xpose.msra.mxu0 %v484_v31  ;;  %803 = vmatpush3.bf16.xpose.msra.mxu1 %v539_v32  ;;  %v425_v34 = vadd.f32 %v774_v33, %v1012_v23  ;;  %v416_v35 = vpop.f32.mrb[25].mxu1  ;;  %v627_v31 = vrot.slane %v625_v30, 1 }
 0x10f   :  { %792 = vmatprep.subr.bf16.mxu0 %v876_v3  ;;  %804 = vmatprep.subr.bf16.mxu1 %v876_v3  ;;  %v417_v36 = vadd.f32 %v1012_v23, %v416_v35  ;;  %v775_v37 = vpop.f32.mrb[26].mxu1 }
 0x110   :  { %v428_v38 = vadd.f32 %v775_v37, %v1012_v23  ;;  %v419_v39 = vpop.f32.mrb[27].mxu1 }
 0x111   :  { %v420_v40 = vadd.f32 %v1012_v23, %v419_v39 }
 0x112   :  { %v462_v41 = vpack.c.bf16 %v428_v38, %v425_v34 }
 0x113   :  { %v461_v42 = vpack.c.bf16 %v420_v40, %v417_v36 }
 0x114   :  { %v551_v62 = vsel %vm90_vm0, %v462_v41, 0 }
 0x115   :  { %v778_v45 = vpop.f32.mrb[28].mxu1  ;;  %v548_v61 = vsel %vm90_vm0, %v461_v42, 0 }
 0x116   :  { %793 = vmatpush3.bf16.xpose.msra.mxu0 %v487_v43  ;;  %805 = vmatpush3.bf16.xpose.msra.mxu1 %v542_v44  ;;  %v441_v46 = vadd.f32 %v778_v45, %v1012_v23  ;;  %v432_v48 = vpop.f32.mrb[29].mxu1 }
 0x117   :  { %794 = vmatprep.subr.bf16.mxu0 %v876_v3  ;;  %806 = vmatprep.subr.bf16.mxu1 %v876_v3  ;;  %v433_v49 = vadd.f32 %v1012_v23, %v432_v48  ;;  %v779_v50 = vpop.f32.mrb[30].mxu1 }
 0x118   :  { %v444_v51 = vadd.f32 %v779_v50, %v1012_v23  ;;  %v435_v52 = vpop.f32.mrb[31].mxu1 }
 0x119   :  { %v436_v54 = vadd.f32 %v1012_v23, %v435_v52  ;;  %v447_v23 = vpack.c.bf16 %v129_v60, %v129_v60 }
 0x11a   :  { %v464_v55 = vpack.c.bf16 %v444_v51, %v441_v46 }
 0x11b   :  { %v463_v57 = vpack.c.bf16 %v436_v54, %v433_v49 }
 0x11c   :  { %v557_v47 = vsel %vm90_vm0, %v464_v55, 0 }
 0x11d   :  { %v554_v63 = vsel %vm90_vm0, %v463_v57, 0 }
 0x11e   :  { %795 = vmatpush3.bf16.xpose.msra.mxu0 %v490_v58  ;;  %807 = vmatpush3.bf16.xpose.msra.mxu1 %v545_v59 }
 0x11f   :  { %808 = vmatprep.subr.bf16.mxu1 %v876_v3 }
 0x125   :  { %797 = vmatmul.mubr.msk.bf16.vlgmr.msra.gmra.mrb[4].mxu0 %vm90_vm0, %v447_v23 }
 0x126   :  { %809 = vmatpush3.bf16.xpose.msra.mxu1 %v548_v61 }
 0x127   :  { %810 = vmatprep.subr.bf16.mxu1 %v876_v3 }
 0x12e   :  { %811 = vmatpush3.bf16.xpose.msra.mxu1 %v551_v62 }
 0x12f   :  { %812 = vmatprep.subr.bf16.mxu1 %v876_v3 }
 0x136   :  { %813 = vmatpush3.bf16.xpose.msra.mxu1 %v554_v63 }
 0x137   :  { %814 = vmatprep.subr.bf16.mxu1 %v876_v3 }
 0x13e   :  { %815 = vmatpush3.bf16.xpose.msra.mxu1 %v557_v47 }
 0x145   :  { %817 = vmatmul.mubr.msk.bf16.vlgmr.msra.gmra.mrb[32].mxu1 %vm90_vm0, %v448_v1 }
 0x1f8   :  { %v526_v2 = vpop.f32.mrb[4].mxu0 }
 0x1f9   :  { %v798_v4 = vpop.f32.mrb[5].mxu0  ;;  %v599_v7 = vrot.slane %v526_v2, 4 }
 0x1fa   :  { %v529_v5 = vpop.f32.mrb[6].mxu0 }
 0x1fb   :  { %v799_v6 = vpop.f32.mrb[7].mxu0  ;;  %v600_v8 = vmax.f32 %v526_v2, %v599_v7 }
 0x1fd   :  { %v601_v9 = vrot.slane %v600_v8, 2 }
 0x1ff   :  { %v602_v10 = vmax.f32 %v600_v8, %v601_v9 }
 0x201   :  { %v603_v11 = vrot.slane %v602_v10, 1 }
 0x203   :  { %v604_v12 = vmax.f32 %v602_v10, %v603_v11 }
 0x205   :  { %v695_v53 = vmul.f32 -0.088388346, %v604_v12 }
 0x207   :  { %v615_v20 = vmul.f32 1.442695, %v695_v53 }
 0x209   :  { %844 = vpow2.f32 %v615_v20 }
 0x213   :  { %v845_v26 = vpop.eup %844 }
 0x214   :  { %v619_v27 = vadd.f32 1.0, %v845_v26 }
 0x218   :  { %v593_v13 = vpop.f32.mrb[32].mxu1 }
 0x219   :  { %v605_v3 = vrot.slane %v593_v13, 4  ;;  %v818_v14 = vpop.f32.mrb[33].mxu1 }
 0x21a   :  { %v596_v15 = vpop.f32.mrb[34].mxu1 }
 0x21b   :  { %v606_v16 = vmax.f32 %v593_v13, %v605_v3  ;;  %v819_v17 = vpop.f32.mrb[35].mxu1 }
 0x21d   :  { %v607_v18 = vrot.slane %v606_v16, 2 }
 0x21f   :  { %v608_v19 = vmax.f32 %v606_v16, %v607_v18 }
 0x221   :  { %v609_v21 = vrot.slane %v608_v19, 1 }
 0x223   :  { %v610_v22 = vmax.f32 %v608_v19, %v609_v21 }
 0x225   :  { %v696_v24 = vmul.f32 -0.088388346, %v610_v22 }
 0x227   :  { %v617_v25 = vmul.f32 1.442695, %v696_v24 }
 0x229   :  { %846 = vpow2.f32 %v617_v25 }
 0x22a   :  { %848 = vrcp.f32 %v619_v27 }
 0x233   :  { %v847_v28 = vpop.eup %846 }
 0x234   :  { %v620_v29 = vadd.f32 1.0, %v847_v28  ;;  %v849_v32 = vpop.eup %848 }
 0x235   :  { %v630_v35 = vmul.f32 %v849_v32, %v625_v30 }
 0x236   :  { %850 = vrcp.f32 %v620_v29 }
 0x240   :  { %v851_v33 = vpop.eup %850 }
 0x241   :  { %v631_v34 = vmul.f32 %v851_v33, %v627_v31 }
 0x243   :  { %v634_v36 = vrot.slane %v631_v34, 7 }
 0x245   :  { %v636_v37 = vsel %vm635_vm2, %v634_v36, %v630_v35 }
 0x246   :  { %638 = vst [vmem:[#allocation2] sm:$0x3] %v636_v37 }
 0x247   :  { %863 = shalt.err (!%p860_p4)
}
 0x248   :  { %s864_s23 = scalar_lea.hbm %s1118_s7, 32 }
 0x249   :  { %p865_p5 = scmp.ne.s32.totalorder %s1118_s7, %s864_s23  ;;  %p868_p6 = scmp.lt.u32.totalorder %s864_s23, %s1118_s7 }
 0x24b   :  { %p870_p7 = pnand %p868_p6, %p865_p5 }
 0x24d   :  { %873 = shalt.err (!%p870_p7)
}
 0x24e   :  { %648 = dma.vmem_to_hbm [thread:$0]  %s646_s20, 32, %s1118_s7, [#allocation3]  }
 0x24f   :  { %874 = dma.done.wait [#allocation3], 32  }
 0x250   :  { %875 = vsyncadd [#allocation3], 4294967264 }
 0x251   :  { %652 = vsyncpa [#allocation3], 1 }

</bundles_post_ra>
